<compile_context>
chip_gen: v5e
topology: v5e:2x2
jax: 0.10.0
libtpu: 0.0.40
codegen_flags: <defaults>
</compile_context>

<pallas_src>
import math
import functools

import jax
import jax.numpy as jnp
from jax.experimental import pallas as pl
from jax.experimental.pallas import tpu as pltpu


def factorial_odd(k):
    """1 * 3 * ... * k (or k-1)."""
    p = 1
    for i in range(3, k + 1, 2):
        p *= i
    return p


def wls_coeffs(up_to):
    means = [1]
    for i in range(1, up_to + 1):
        means.append(0 if i % 2 == 1 else factorial_odd(i))
    variances = [1]
    for i in range(1, up_to + 1):
        if i % 2 == 1:
            variances.append(factorial_odd(2 * i))
        else:
            variances.append(factorial_odd(2 * i) - factorial_odd(i) ** 2)
    return means, [math.sqrt(v) for v in variances]


def _round_up(x, m):
    return (x + m - 1) // m * m


# --------------- kernel 1: polynomial feature expansion (VPU) ---------------
def _expand_kernel(feat_ref, h_ref, *, order, means, stds, scale, d_pad):
    x = feat_ref[...].astype(jnp.float32)           # (tm, D), f32 math (v5e ok)
    rows, d = x.shape
    cols = []
    p = x
    for i in range(1, order + 1):
        if i > 1:
            p = p * x                               # x**i built incrementally
        coef = (scale ** i) / stds[i]
        # means[i] == 0 for odd i -> skip the dead subtraction.
        cols.append(p * coef if means[i] == 0 else (p - means[i]) * coef)
    pad = d_pad - order * d
    if pad > 0:
        cols.append(jnp.zeros((rows, pad), jnp.float32))
    h_ref[...] = jnp.concatenate(cols, axis=-1)     # single lane-dense store


# --------------- kernel 2: tiled adjacency SpMM (MXU reduction) -------------
def _spmm_kernel(adj_ref, h_ref, out_ref, acc_ref):
    k = pl.program_id(1)

    @pl.when(k == 0)
    def _():
        acc_ref[...] = jnp.zeros_like(acc_ref)

    # adj tile arrives as bf16 (half the HBM traffic); accumulate in f32.
    acc_ref[...] += jnp.dot(adj_ref[...].astype(jnp.float32), h_ref[...],
                            preferred_element_type=jnp.float32)

    @pl.when(k == pl.num_programs(1) - 1)
    def _():
        out_ref[...] = acc_ref[...].astype(out_ref.dtype)


def wls_entry_layer(adj, features, *, order, scale,
                    block_m=256, block_k=512, adj_dtype=jnp.bfloat16):
    """Pallas implementation of WLSEntryLayer.forward.

    adj:      (N, N) dense adjacency; adj[v, u] = weight of edge u -> v
              (binary 0/1 if edge_weight=False).
    features: (N, D) node features.
    adj_dtype: storage/streaming dtype for the O(N^2) adjacency (bf16 default,
               None keeps the input dtype). Accumulation is always f32.
    returns:  (N, D * order) float32 aggregated expanded features.
    """
    N, D = features.shape
    d_out = D * order
    d_pad = _round_up(d_out, 128)                   # lane-dense RHS / output
    means, stds = wls_coeffs(order + 1)

    # Tile sizes aligned to (8, 128); shrink for small graphs.
    n_align = _round_up(N, 128)
    tm = min(block_m, n_align)
    tk = min(block_k, n_align)
    n_pad = _round_up(N, math.lcm(tm, tk))

    feats_p = jnp.pad(features.astype(jnp.float32), ((0, n_pad - N), (0, 0)))
    adj_p = jnp.pad(adj, ((0, n_pad - N), (0, n_pad - N)))
    if adj_dtype is not None:
        adj_p = adj_p.astype(adj_dtype)

    # ---- expansion: h = (n_pad, d_pad), computed once, lane-dense ----
    expand = functools.partial(
        _expand_kernel, order=order,
        means=tuple(float(m) for m in means),
        stds=tuple(float(s) for s in stds),
        scale=float(scale), d_pad=d_pad)
    h = pl.pallas_call(
        expand,
        out_shape=jax.ShapeDtypeStruct((n_pad, d_pad), jnp.float32),
        grid_spec=pltpu.PrefetchScalarGridSpec(
            num_scalar_prefetch=0,
            grid=(n_pad // tm,),
            in_specs=[pl.BlockSpec((tm, D), lambda i: (i, 0))],
            out_specs=pl.BlockSpec((tm, d_pad), lambda i: (i, 0))),
        compiler_params=pltpu.CompilerParams(
            dimension_semantics=("parallel",)),
    )(feats_p)

    # ---- tiled, pipelined SpMM over the padded graph ----
    adj_bytes = n_pad * n_pad * adj_p.dtype.itemsize
    h_bytes = n_pad * d_pad * 4
    out_bytes = n_pad * d_pad * 4
    out_p = pl.pallas_call(
        _spmm_kernel,
        out_shape=jax.ShapeDtypeStruct((n_pad, d_pad), jnp.float32),
        grid_spec=pltpu.PrefetchScalarGridSpec(
            num_scalar_prefetch=0,
            grid=(n_pad // tm, n_pad // tk),
            in_specs=[pl.BlockSpec((tm, tk), lambda i, k: (i, k)),
                      pl.BlockSpec((tk, d_pad), lambda i, k: (k, 0))],
            out_specs=pl.BlockSpec((tm, d_pad), lambda i, k: (i, 0)),
            scratch_shapes=[pltpu.VMEM((tm, d_pad), jnp.float32)]),
        compiler_params=pltpu.CompilerParams(
            dimension_semantics=("parallel", "arbitrary"),
            vmem_limit_bytes=32 * 1024 * 1024),
        cost_estimate=pl.CostEstimate(
            flops=2 * n_pad * n_pad * d_pad,
            transcendentals=0,
            bytes_accessed=adj_bytes + (n_pad // tm) * h_bytes + out_bytes),
    )(adj_p, h)

    return out_p[:N, :d_out]


def _reference(adj, features, order, scale):
    means, stds = wls_coeffs(order + 1)
    cols = [(features ** i - means[i]) / stds[i] * scale ** i
            for i in range(1, order + 1)]
    h = jnp.concatenate(cols, axis=-1)
    return adj @ h


if __name__ == "__main__":
    # Small deterministic example: N=32 nodes, in_dim=8, order=3, scale=0.5,
    # edge_weight=True (weighted dense adjacency).
    N, D, order, scale = 32, 8, 3, 0.5
    key = jax.random.PRNGKey(0)
    k1, k2, k3 = jax.random.split(key, 3)

    features = jax.random.normal(k1, (N, D), dtype=jnp.float32)
    edge_mask = (jax.random.uniform(k2, (N, N)) < 0.25).astype(jnp.float32)
    edge_w = jax.random.uniform(k3, (N, N), dtype=jnp.float32)
    adj = edge_mask * edge_w

    ref = _reference(adj, features, order, scale)

    # Exact-semantics path (f32 adjacency streaming).
    out_f32 = wls_entry_layer(adj, features, order=order, scale=scale,
                              adj_dtype=None)
    out_f32 = jax.block_until_ready(out_f32)
    assert out_f32.shape == (N, D * order)
    assert jnp.allclose(out_f32, ref, rtol=1e-3, atol=1e-3), "f32 mismatch"

    # Default bandwidth-optimized path (bf16 adjacency streaming, f32 accum).
    out_bf16 = wls_entry_layer(adj, features, order=order, scale=scale)
    out_bf16 = jax.block_until_ready(out_bf16)
    assert out_bf16.shape == (N, D * order)
    assert jnp.allclose(out_bf16, ref, rtol=2e-2, atol=2e-2), "bf16 mismatch"

    print("KERNEL_OK")
</pallas_src>

<mosaic_0001>
module attributes {stable_mosaic.version = 11 : i64} {
  func.func @_expand_kernel(%arg0: i32, %arg1: memref<128x8xf32, #tpu.memory_space<vmem>>, %arg2: memref<128x128xf32, #tpu.memory_space<vmem>>) attributes {dimension_semantics = [#tpu.dimension_semantics<parallel>], iteration_bounds = array<i64: 1>, scalar_prefetch = 0 : i64, scratch_operands = 0 : i64, tpu.core_type = #tpu.core_type<tc>, window_params = [{transform_indices = @transform_0, window_bounds = array<i64: 128, 8>}, {transform_indices = @transform_1, window_bounds = array<i64: 128, 128>}]} {
    %c0 = arith.constant 0 : index
    %c0_0 = arith.constant 0 : index
    %0 = vector.load %arg1[%c0, %c0_0] : memref<128x8xf32, #tpu.memory_space<vmem>>, vector<128x8xf32>
    %cst = arith.constant 5.000000e-01 : f32
    %1 = vector.broadcast %cst : f32 to vector<128x8xf32>
    %2 = arith.mulf %0, %1 : vector<128x8xf32>
    %3 = arith.mulf %0, %0 : vector<128x8xf32>
    %cst_1 = arith.constant 1.000000e+00 : f32
    %4 = vector.broadcast %cst_1 : f32 to vector<128x8xf32>
    %5 = arith.subf %3, %4 : vector<128x8xf32>
    %cst_2 = arith.constant 0.176776692 : f32
    %6 = vector.broadcast %cst_2 : f32 to vector<128x8xf32>
    %7 = arith.mulf %5, %6 : vector<128x8xf32>
    %8 = arith.mulf %3, %0 : vector<128x8xf32>
    %cst_3 = arith.constant 0.0322748609 : f32
    %9 = vector.broadcast %cst_3 : f32 to vector<128x8xf32>
    %10 = arith.mulf %8, %9 : vector<128x8xf32>
    %cst_4 = arith.constant 0.000000e+00 : f32
    %11 = vector.broadcast %cst_4 : f32 to vector<128x104xf32>
    %12 = tpu.concatenate %2, %7, %10, %11 in 1 : vector<128x8xf32>, vector<128x8xf32>, vector<128x8xf32>, vector<128x104xf32> -> vector<128x128xf32>
    %c0_5 = arith.constant 0 : index
    %c0_6 = arith.constant 0 : index
    %13 = vector.load %arg2[%c0_5, %c0_6] : memref<128x128xf32, #tpu.memory_space<vmem>>, vector<128x128xf32>
    tpu.vector_store %arg2[%c0_5, %c0_6], %12 {strides = array<i32>} : memref<128x128xf32, #tpu.memory_space<vmem>>, vector<128x128xf32>,
    return
  }
  func.func @transform_0(%arg0: i32) -> (i32, i32) {
    %c0_i32 = arith.constant 0 : i32
    %c0_i32_0 = arith.constant 0 : i32
    return %arg0, %c0_i32 : i32, i32
  }
  func.func @transform_1(%arg0: i32) -> (i32, i32) {
    %c0_i32 = arith.constant 0 : i32
    %c0_i32_0 = arith.constant 0 : i32
    return %arg0, %c0_i32 : i32, i32
  }
}

</mosaic_0001>

<bundles_post_ra>
// kernel: tpu_custom_call.1
= control target key start
LH: loop header
LB: loop body
LE: loop exit
PB: predicated region body
PF: predicated region fallthrough
CT: control target
= control target key end

     0   :  { %s380_s18 = smov 8   ;;  %s681_s0 = inlined_call_operand.vmem [shape: f32[128,8], index: 0, kind: input, shape index: {}]   ;;  %s682_s1 = inlined_call_operand.hbm [shape: f32[128,128], index: 1, kind: output, shape index: {}]  }
   0x1   :  { %v397_v0 = vld [vmem:[%s681_s0 + $0x20] sm:$0xff]  ;;  %v402_v1 = vld [vmem:[%s681_s0 + $0x10] sm:$0xff]  ;;  %v424_v6 = vld [vmem:[%s681_s0 + $0x28] sm:$0xff] }
   0x2   :  { %v407_v2 = vld [vmem:[%s681_s0] sm:$0xff]  ;;  %v411_v3 = vmul.f32 %v397_v0, %v397_v0  ;;  %v415_v4 = vmul.f32 %v402_v1, %v402_v1  ;;  %v429_v7 = vld [vmem:[%s681_s0 + $0x18] sm:$0xff]  ;;  %v434_v8 = vld [vmem:[%s681_s0 + $0x8] sm:$0xff]  ;;  %v438_v9 = vmul.f32 %v424_v6, %v424_v6 }
   0x3   :  { %v419_v5 = vmul.f32 %v407_v2, %v407_v2  ;;  %v445_v13 = vmul.f32 %v429_v7, %v429_v7  ;;  %v449_v14 = vmul.f32 %v434_v8, %v434_v8 }
   0x4   :  { %v338_v10 = vadd.f32 -1.0, %v411_v3  ;;  %v336_v11 = vadd.f32 -1.0, %v415_v4  ;;  %v339_v18 = vadd.f32 -1.0, %v438_v9 }
   0x5   :  { %v334_v12 = vadd.f32 -1.0, %v419_v5  ;;  %v337_v19 = vadd.f32 -1.0, %v445_v13 }
   0x6   :  { %v77_v15 = vmul.f32 0.17677669, %v338_v10  ;;  %v75_v16 = vmul.f32 0.17677669, %v336_v11 }
   0x7   :  { %v73_v17 = vmul.f32 0.17677669, %v334_v12 }
   0x8   :  { %145 = vrot.lane.b32.xlu2 %v77_v15, %s380_s18  ;;  %141 = vrot.lane.b32.xlu1 %v75_v16, %s380_s18 }
   0x9   :  { %6 = vsyncpa [#allocation3], 0  ;;  %137 = vrot.lane.b32.xlu0 %v73_v17, %s380_s18  ;;  %v335_v20 = vadd.f32 -1.0, %v449_v14  ;;  %v460_v21 = vld [vmem:[%s681_s0 + $0x40] sm:$0xff]  ;;  %v465_v22 = vld [vmem:[%s681_s0 + $0x38] sm:$0xff]  ;;  %v90_v62 = vmul.f32 %v449_v14, %v434_v8  ;;  %v89_v63 = vmul.f32 %v419_v5, %v407_v2  ;;  %v93_v16 = vmul.f32 %v411_v3, %v397_v0  ;;  %s382_s10 = smov [#allocation2]  }
   0xa   :  { %v470_v23 = vld [vmem:[%s681_s0 + $0x30] sm:$0xff]  ;;  %v78_v24 = vmul.f32 0.17677669, %v339_v18  ;;  %v76_v25 = vmul.f32 0.17677669, %v337_v19  ;;  %v474_v26 = vmul.f32 %v460_v21, %v460_v21  ;;  %v478_v27 = vmul.f32 %v465_v22, %v465_v22  ;;  %v493_v33 = vld [vmem:[%s681_s0 + $0x58] sm:$0xff] }
   0xb   :  { %v74_v28 = vmul.f32 0.17677669, %v335_v20  ;;  %v482_v29 = vmul.f32 %v470_v23, %v470_v23  ;;  %v498_v34 = vld [vmem:[%s681_s0 + $0x50] sm:$0xff]  ;;  %v503_v35 = vld [vmem:[%s681_s0 + $0x48] sm:$0xff]  ;;  %v507_v38 = vmul.f32 %v493_v33, %v493_v33  ;;  %v530_v47 = vld [vmem:[%s681_s0 + $0x60] sm:$0xff]  ;;  %v92_v14 = vmul.f32 %v445_v13, %v429_v7  ;;  %s320_s11 = sshll.u32 %s382_s10, 4  ;;  %s321_s11 = int_to_ptr.vmem [resolvable:$true] %s320_s11 }
   0xc   :  { %v342_v30 = vadd.f32 -1.0, %v474_v26  ;;  %v341_v31 = vadd.f32 -1.0, %v478_v27  ;;  %v51_v39 = vmul.f32 %v498_v34, %v498_v34  ;;  %v50_v41 = vmul.f32 %v503_v35, %v503_v35  ;;  %v520_v45 = vld [vmem:[%s681_s0 + $0x70] sm:$0xff]  ;;  %v525_v46 = vld [vmem:[%s681_s0 + $0x68] sm:$0xff]  ;;  %v547_v57 = vld [vmem:[%s681_s0 + $0x78] sm:$0xff]  ;;  %s381_s0 = smov 16  }
   0xd   :  { %v340_v32 = vadd.f32 -1.0, %v482_v29  ;;  %v345_v42 = vadd.f32 -1.0, %v507_v38  ;;  %v534_v50 = vmul.f32 %v520_v45, %v520_v45  ;;  %v54_v51 = vmul.f32 %v525_v46, %v525_v46  ;;  %s322_s14 = sshll.u32 %s682_s1, 4  ;;  %s383_s1 = smov 128   ;;  %s323_s14 = int_to_ptr.hbm [resolvable:$true] %s322_s14 }
   0xe   :  { %v81_v36 = vmul.f32 0.17677669, %v342_v30  ;;  %v80_v37 = vmul.f32 0.17677669, %v341_v31  ;;  %v344_v43 = vadd.f32 -1.0, %v51_v39  ;;  %v343_v44 = vadd.f32 -1.0, %v50_v41 }
   0xf   :  { %v79_v40 = vmul.f32 0.17677669, %v340_v32  ;;  %v84_v48 = vmul.f32 0.17677669, %v345_v42  ;;  %v53_v53 = vmul.f32 %v530_v47, %v530_v47  ;;  %v348_v54 = vadd.f32 -1.0, %v534_v50 }
  0x10   :  { %147 = vrot.lane.b32.xlu2 %v78_v24, %s380_s18  ;;  %143 = vrot.lane.b32.xlu1 %v76_v25, %s380_s18  ;;  %v83_v49 = vmul.f32 0.17677669, %v344_v43  ;;  %v82_v52 = vmul.f32 0.17677669, %v343_v44  ;;  %v347_v55 = vadd.f32 -1.0, %v54_v51  ;;  %v56_v61 = vmul.f32 %v547_v57, %v547_v57 }
  0x11   :  { %139 = vrot.lane.b32.xlu0 %v74_v28, %s380_s18  ;;  %v346_v56 = vadd.f32 -1.0, %v53_v53  ;;  %v87_v58 = vmul.f32 0.17677669, %v348_v54  ;;  %v106_v11 = vmul.f32 0.03227486, %v90_v62  ;;  %v91_v5 = vmul.f32 %v415_v4, %v402_v1 }
  0x12   :  { %v86_v59 = vmul.f32 0.17677669, %v347_v55  ;;  %v349_v10 = vadd.f32 -1.0, %v56_v61  ;;  %v105_v12 = vmul.f32 0.03227486, %v89_v63  ;;  %v96_v20 = vmul.f32 %v478_v27, %v465_v22 }
  0x13   :  { %v85_v60 = vmul.f32 0.17677669, %v346_v56  ;;  %v109_v17 = vmul.f32 0.03227486, %v93_v16  ;;  %v108_v18 = vmul.f32 0.03227486, %v92_v14  ;;  %v95_v3 = vmul.f32 %v482_v29, %v470_v23 }
  0x14   :  { %v88_v15 = vmul.f32 0.17677669, %v349_v10  ;;  %v107_v19 = vmul.f32 0.03227486, %v91_v5  ;;  %v94_v13 = vmul.f32 %v438_v9, %v424_v6  ;;  %v112_v24 = vmul.f32 0.03227486, %v96_v20 }
  0x15   :  { %v111_v4 = vmul.f32 0.03227486, %v95_v3  ;;  %v99_v28 = vmul.f32 %v51_v39, %v498_v34  ;;  %v98_v30 = vmul.f32 %v50_v41, %v503_v35  ;;  %v97_v27 = vmul.f32 %v474_v26, %v460_v21 }
  0x16   :  { %v110_v25 = vmul.f32 0.03227486, %v94_v13  ;;  %v102_v9 = vmul.f32 %v54_v51, %v525_v46  ;;  %v104_v26 = vmul.f32 %v56_v61, %v547_v57  ;;  %v103_v42 = vmul.f32 %v534_v50, %v520_v45 }
  0x17   :  { %v115_v29 = vmul.f32 0.03227486, %v99_v28  ;;  %v114_v31 = vmul.f32 0.03227486, %v98_v30  ;;  %v113_v32 = vmul.f32 0.03227486, %v97_v27 }
  0x18   :  { %153 = vrot.lane.b32.xlu2 %v81_v36, %s380_s18  ;;  %151 = vrot.lane.b32.xlu1 %v80_v37, %s380_s18  ;;  %v101_v36 = vmul.f32 %v53_v53, %v530_v47  ;;  %v100_v37 = vmul.f32 %v507_v38, %v493_v33  ;;  %v118_v39 = vmul.f32 0.03227486, %v102_v9  ;;  %v120_v43 = vmul.f32 0.03227486, %v104_v26 }
  0x19   :  { %149 = vrot.lane.b32.xlu0 %v79_v40, %s380_s18  ;;  %v119_v44 = vmul.f32 0.03227486, %v103_v42  ;;  %vm249_vm0 = vcmask 64512   ;;  %vm266_vm1 = vcmask 130048   ;;  %vm283_vm2 = vcmask 195584  }
  0x1a   :  { %v117_v40 = vmul.f32 0.03227486, %v101_v36  ;;  %v116_v41 = vmul.f32 0.03227486, %v100_v37  ;;  %v27_v36 = vmul.f32 0.5, %v402_v1 }
  0x20   :  { %159 = vrot.lane.b32.xlu2 %v84_v48, %s380_s18  ;;  %157 = vrot.lane.b32.xlu1 %v83_v49, %s380_s18  ;;  %v30_v48 = vmul.f32 0.5, %v424_v6 }
  0x21   :  { %155 = vrot.lane.b32.xlu0 %v82_v52, %s380_s18 }
  0x28   :  { %165 = vrot.lane.b32.xlu2 %v87_v58, %s380_s18  ;;  %163 = vrot.lane.b32.xlu1 %v86_v59, %s380_s18  ;;  %v26_v59 = vmul.f32 0.5, %v434_v8 }
  0x29   :  { %161 = vrot.lane.b32.xlu0 %v85_v60, %s380_s18 }
  0x30   :  { %203 = vrot.lane.b32.xlu2 %v106_v11, %s381_s0  ;;  %201 = vrot.lane.b32.xlu1 %v105_v12, %s381_s0  ;;  %v29_v11 = vmul.f32 0.5, %v397_v0 }
  0x31   :  { %167 = vrot.lane.b32.xlu0 %v88_v15, %s380_s18 }
  0x38   :  { %209 = vrot.lane.b32.xlu2 %v109_v17, %s381_s0  ;;  %207 = vrot.lane.b32.xlu1 %v108_v18, %s381_s0  ;;  %v32_v17 = vmul.f32 0.5, %v465_v22 }
  0x39   :  { %205 = vrot.lane.b32.xlu0 %v107_v19, %s381_s0 }
  0x40   :  { %215 = vrot.lane.b32.xlu2 %v112_v24, %s381_s0  ;;  %213 = vrot.lane.b32.xlu1 %v111_v4, %s381_s0  ;;  %v25_v24 = vmul.f32 0.5, %v407_v2  ;;  %v35_v4 = vmul.f32 0.5, %v498_v34  ;;  %v28_v2 = vmul.f32 0.5, %v429_v7  ;;  %v38_v34 = vmul.f32 0.5, %v525_v46 }
  0x41   :  { %211 = vrot.lane.b32.xlu0 %v110_v25, %s381_s0 }
  0x48   :  { %221 = vrot.lane.b32.xlu2 %v115_v29, %s381_s0  ;;  %219 = vrot.lane.b32.xlu1 %v114_v31, %s381_s0 }
  0x49   :  { %217 = vrot.lane.b32.xlu0 %v113_v32, %s381_s0 }
  0x50   :  { %227 = vrot.lane.b32.xlu2 %v118_v39, %s381_s0  ;;  %225 = vrot.lane.b32.xlu1 %v117_v40, %s381_s0 }
  0x51   :  { %223 = vrot.lane.b32.xlu0 %v116_v41, %s381_s0 }
  0x58   :  { %231 = vrot.lane.b32.xlu1 %v120_v43, %s381_s0 }
  0x59   :  { %229 = vrot.lane.b32.xlu0 %v119_v44, %s381_s0 }
  0x62   :  { %v146_v38 = vpop.permute.xlu2 %145 }
  0x63   :  { %v254_v12 = vsel %vm249_vm0, %v29_v11, %v146_v38 }
  0x6a   :  { %v148_v49 = vpop.permute.xlu2 %147 }
  0x6b   :  { %v600_v51 = vsel %vm249_vm0, %v30_v48, %v148_v49  ;;  %v31_v48 = vmul.f32 0.5, %v470_v23  ;;  %v33_v23 = vmul.f32 0.5, %v460_v21  ;;  %v36_v21 = vmul.f32 0.5, %v493_v33 }
  0x6c   :  { %v39_v33 = vmul.f32 0.5, %v520_v45 }
  0x72   :  { %v602_v52 = vpop.permute.xlu2 %153 }
  0x7a   :  { %v604_v53 = vpop.permute.xlu2 %159  ;;  %v142_v54 = vpop.permute.xlu1 %141 }
  0x7b   :  { %v138_v50 = vpop.permute.xlu0 %137  ;;  %v252_v26 = vsel %vm249_vm0, %v27_v36, %v142_v54 }
  0x7c   :  { %v250_v25 = vsel %vm249_vm0, %v25_v24, %v138_v50 }
  0x82   :  { %v606_v55 = vpop.permute.xlu2 %165  ;;  %v144_v56 = vpop.permute.xlu1 %143 }
  0x83   :  { %v140_v58 = vpop.permute.xlu0 %139  ;;  %v253_v37 = vsel %vm249_vm0, %v28_v2, %v144_v56 }
  0x84   :  { %v251_v6 = vsel %vm249_vm0, %v26_v59, %v140_v58 }
  0x8a   :  { %v152_v60 = vpop.permute.xlu1 %151  ;;  %v204_v61 = vpop.permute.xlu2 %203 }
  0x8b   :  { %v268_v62 = vsel %vm266_vm1, %v251_v6, %v204_v61  ;;  %v150_v63 = vpop.permute.xlu0 %149  ;;  %v257_v18 = vsel %vm249_vm0, %v32_v17, %v152_v60  ;;  %v34_v60 = vmul.f32 0.5, %v503_v35  ;;  %v37_v35 = vmul.f32 0.5, %v530_v47 }
  0x8c   :  { %v285_v10 = vsel %vm283_vm2, %v268_v62, 0.0  ;;  %v256_v49 = vsel %vm249_vm0, %v31_v48, %v150_v63  ;;  %v258_v63 = vsel %vm249_vm0, %v33_v23, %v602_v52  ;;  %v261_v52 = vsel %vm249_vm0, %v36_v21, %v604_v53 }
  0x8d   :  { %301 = vst [vmem:[#allocation2 + $0x8] sm:$0xff] %v285_v10  ;;  %v40_v47 = vmul.f32 0.5, %v547_v57 }
  0x92   :  { %v158_v15 = vpop.permute.xlu1 %157  ;;  %v210_v16 = vpop.permute.xlu2 %209 }
  0x93   :  { %v271_v8 = vsel %vm266_vm1, %v254_v12, %v210_v16  ;;  %v156_v14 = vpop.permute.xlu0 %155  ;;  %v260_v28 = vsel %vm249_vm0, %v35_v4, %v158_v15 }
  0x94   :  { %v288_v5 = vsel %vm283_vm2, %v271_v8, 0.0  ;;  %v259_v61 = vsel %vm249_vm0, %v34_v60, %v156_v14 }
  0x95   :  { %304 = vst [vmem:[#allocation2 + $0x20] sm:$0xff] %v288_v5 }
  0x9a   :  { %v164_v19 = vpop.permute.xlu1 %163  ;;  %v216_v20 = vpop.permute.xlu2 %215 }
  0x9b   :  { %v274_v3 = vsel %vm266_vm1, %v257_v18, %v216_v20  ;;  %v162_v13 = vpop.permute.xlu0 %161  ;;  %v263_v39 = vsel %vm249_vm0, %v38_v34, %v164_v19 }
  0x9c   :  { %v291_v0 = vsel %vm283_vm2, %v274_v3, 0.0  ;;  %v262_v16 = vsel %vm249_vm0, %v37_v35, %v162_v13  ;;  %v264_v3 = vsel %vm249_vm0, %v39_v33, %v606_v55 }
  0x9d   :  { %307 = vst [vmem:[#allocation2 + $0x38] sm:$0xff] %v291_v0 }
  0xa2   :  { %v222_v30 = vpop.permute.xlu2 %221  ;;  %v202_v22 = vpop.permute.xlu1 %201 }
  0xa3   :  { %v277_v27 = vsel %vm266_vm1, %v260_v28, %v222_v30  ;;  %v267_v29 = vsel %vm266_vm1, %v250_v25, %v202_v22  ;;  %v626_v31 = vpop.permute.xlu0 %167 }
  0xa4   :  { %v294_v32 = vsel %vm283_vm2, %v277_v27, 0.0  ;;  %v284_v9 = vsel %vm283_vm2, %v267_v29, 0.0  ;;  %v265_v53 = vsel %vm249_vm0, %v40_v47, %v626_v31 }
  0xa5   :  { %310 = vst [vmem:[#allocation2 + $0x50] sm:$0xff] %v294_v32 }
  0xa6   :  { %300 = vst [vmem:[#allocation2] sm:$0xff] %v284_v9 }
  0xaa   :  { %v228_v40 = vpop.permute.xlu2 %227  ;;  %v208_v41 = vpop.permute.xlu1 %207 }
  0xab   :  { %v280_v42 = vsel %vm266_vm1, %v263_v39, %v228_v40  ;;  %v270_v43 = vsel %vm266_vm1, %v253_v37, %v208_v41  ;;  %v206_v44 = vpop.permute.xlu0 %205 }
  0xac   :  { %v297_v7 = vsel %vm283_vm2, %v280_v42, 0.0  ;;  %v287_v46 = vsel %vm283_vm2, %v270_v43, 0.0  ;;  %v269_v38 = vsel %vm266_vm1, %v252_v26, %v206_v44 }
  0xad   :  { %313 = vst [vmem:[#allocation2 + $0x68] sm:$0xff] %v297_v7  ;;  %v286_v1 = vsel %vm283_vm2, %v269_v38, 0.0 }
  0xae   :  { %303 = vst [vmem:[#allocation2 + $0x18] sm:$0xff] %v287_v46 }
  0xaf   :  { %302 = vst [vmem:[#allocation2 + $0x10] sm:$0xff] %v286_v1 }
  0xb2   :  { %v214_v54 = vpop.permute.xlu1 %213 }
  0xb3   :  { %v273_v50 = vsel %vm266_vm1, %v256_v49, %v214_v54  ;;  %v212_v56 = vpop.permute.xlu0 %211 }
  0xb4   :  { %v290_v58 = vsel %vm283_vm2, %v273_v50, 0.0  ;;  %v272_v59 = vsel %vm266_vm1, %v600_v51, %v212_v56 }
  0xb5   :  { %306 = vst [vmem:[#allocation2 + $0x30] sm:$0xff] %v290_v58  ;;  %v289_v6 = vsel %vm283_vm2, %v272_v59, 0.0 }
  0xb6   :  { %305 = vst [vmem:[#allocation2 + $0x28] sm:$0xff] %v289_v6 }
  0xba   :  { %v220_v62 = vpop.permute.xlu1 %219 }
  0xbb   :  { %v276_v10 = vsel %vm266_vm1, %v259_v61, %v220_v62  ;;  %v218_v11 = vpop.permute.xlu0 %217 }
  0xbc   :  { %v293_v12 = vsel %vm283_vm2, %v276_v10, 0.0  ;;  %v275_v51 = vsel %vm266_vm1, %v258_v63, %v218_v11 }
  0xbd   :  { %309 = vst [vmem:[#allocation2 + $0x48] sm:$0xff] %v293_v12  ;;  %v292_v15 = vsel %vm283_vm2, %v275_v51, 0.0 }
  0xbe   :  { %308 = vst [vmem:[#allocation2 + $0x40] sm:$0xff] %v292_v15 }
  0xc2   :  { %v226_v8 = vpop.permute.xlu1 %225 }
  0xc3   :  { %v279_v14 = vsel %vm266_vm1, %v262_v16, %v226_v8  ;;  %v224_v5 = vpop.permute.xlu0 %223 }
  0xc4   :  { %v296_v17 = vsel %vm283_vm2, %v279_v14, 0.0  ;;  %v278_v18 = vsel %vm266_vm1, %v261_v52, %v224_v5 }
  0xc5   :  { %312 = vst [vmem:[#allocation2 + $0x60] sm:$0xff] %v296_v17  ;;  %v295_v19 = vsel %vm283_vm2, %v278_v18, 0.0 }
  0xc6   :  { %311 = vst [vmem:[#allocation2 + $0x58] sm:$0xff] %v295_v19 }
  0xca   :  { %v232_v20 = vpop.permute.xlu1 %231 }
  0xcb   :  { %v282_v13 = vsel %vm266_vm1, %v265_v53, %v232_v20  ;;  %v230_v0 = vpop.permute.xlu0 %229 }
  0xcc   :  { %v299_v57 = vsel %vm283_vm2, %v282_v13, 0.0  ;;  %v281_v45 = vsel %vm266_vm1, %v264_v3, %v230_v0 }
  0xcd   :  { %315 = vst [vmem:[#allocation2 + $0x78] sm:$0xff] %v299_v57  ;;  %v298_v24 = vsel %vm283_vm2, %v281_v45, 0.0 }
  0xce   :  { %314 = vst [vmem:[#allocation2 + $0x70] sm:$0xff] %v298_v24 }
  0xcf   :  { %328 = dma.vmem_to_hbm [thread:$0]  %s321_s11, 2048, %s323_s14, [#allocation3], %s383_s1, %s383_s1, %s380_s18  }
  0xd0   :  { %378 = dma.done.wait [#allocation3], 2048  }
  0xd1   :  { %379 = vsyncadd [#allocation3], 4294965248 }
  0xd2   :  { %333 = vsyncpa [#allocation3], 1 }

</bundles_post_ra>
